<compile_context>
chip_gen: v5e
topology: v5e:2x2
jax: 0.10.0
libtpu: 0.0.40
codegen_flags: <defaults>
</compile_context>

<pallas_src>
import jax
import jax.numpy as jnp
from jax import lax
from jax.experimental import pallas as pl
from jax.experimental.pallas import tpu as pltpu


def _round_up(x, m):
    return ((x + m - 1) // m) * m


def _pick_tile(dim, cap, align):
    """Tile for `dim`: the full dim if it fits under `cap`, else the largest
    `align`-multiple divisor of `dim` that is <= cap.  Returns None when `dim`
    would have to be padded first (dim > cap and dim % align != 0)."""
    if dim <= cap:
        return dim
    if dim % align:
        return None
    best = align
    t = align
    while t <= cap:
        if dim % t == 0:
            best = t
        t += align
    return best


def _make_kernel(n_k, tk, needs_scratch):
    """Fused linear kernel. Refs: x (tm, F_p) resident, w (tn, tk), b (1, tn),
    o (tm, tn) [+ acc (tm, tn) f32 scratch when the output dtype is not f32].
    Grid axis 2 (K) is the innermost, sequential reduction axis."""

    def accumulate(x_ref, w_ref, b_ref, acc_ref):
        k = pl.program_id(2)

        @pl.when(k == 0)
        def _():
            # Seed the resident accumulator with the broadcast bias so the
            # epilogue is just a cast (or nothing at all for f32 outputs).
            acc_ref[...] = jnp.broadcast_to(
                b_ref[...].astype(jnp.float32), acc_ref.shape)

        if n_k == 1:
            xk = x_ref[...]
        else:
            xk = x_ref[:, pl.ds(pl.multiple_of(k * tk, 128), tk)]

        # Contract the shared F dim directly on the [O, F] weight layout —
        # no wrapper-side transpose; the MXU handles either orientation.
        acc_ref[...] += lax.dot_general(
            xk, w_ref[...],
            dimension_numbers=(((1,), (1,)), ((), ())),
            preferred_element_type=jnp.float32,
        )

    if needs_scratch:
        def kernel(x_ref, w_ref, b_ref, o_ref, acc_ref):
            accumulate(x_ref, w_ref, b_ref, acc_ref)

            @pl.when(pl.program_id(2) == n_k - 1)
            def _():
                o_ref[...] = acc_ref[...].astype(o_ref.dtype)
    else:
        # f32 output: accumulate straight into the resident output block.
        def kernel(x_ref, w_ref, b_ref, o_ref):
            accumulate(x_ref, w_ref, b_ref, o_ref)

    return kernel


def iclassifier_forward(feats, weight, bias, *,
                        tm_cap=256, tn_cap=1024, tk_cap=2048,
                        compute_dtype=None, use_core_parallel=False):
    """IClassifier.forward: feats -> (feats_flat, fc(feats_flat)).

    feats: [N, ...] (flattened to [N, F]); weight: [O, F]; bias: [O].
    compute_dtype: optionally cast x/weight (e.g. jnp.bfloat16) to halve
      HBM weight traffic; None keeps the module's native numerics.
    use_core_parallel: shard the O grid axis across TensorCores (v7x).
    """
    n = feats.shape[0]
    feats_flat = feats.reshape(n, -1)
    f = feats_flat.shape[1]
    o, f_w = weight.shape
    assert f_w == f, "weight feature dim must match flattened feats"

    x, w, b = feats_flat, weight, bias
    if compute_dtype is not None:
        x = x.astype(compute_dtype)
        w = w.astype(compute_dtype)
    out_dtype = feats_flat.dtype

    x_item = jnp.dtype(x.dtype).itemsize
    w_item = jnp.dtype(w.dtype).itemsize
    b_item = jnp.dtype(b.dtype).itemsize
    out_item = jnp.dtype(out_dtype).itemsize

    # ---- tile selection: full dim or an exact aligned divisor -> no weight pad.
    tk = _pick_tile(f, tk_cap, 128)
    if tk is None:
        # Rare fallback (F > tk_cap and F % 128 != 0): must pad the contraction
        # dim of both operands to keep the K reduction correct.
        f_p = _round_up(f, 128)
        tk = _pick_tile(f_p, tk_cap, 128)
    else:
        f_p = f

    tn = _pick_tile(o, tn_cap, 128)
    if tn is None:
        # Rare fallback (O > tn_cap and O % 128 != 0): pad weight/bias along O.
        o_p = _round_up(o, 128)
        tn = _pick_tile(o_p, tn_cap, 128)
    else:
        o_p = o

    # Batch tile: keep the resident (tm, F_p) x block within ~8 MiB so large F
    # doesn't eat the VMEM budget needed for big weight tiles.
    tm_budget = tm_cap
    if 2 * tm_budget * f_p * x_item > (8 << 20):
        tm_budget = max(8, ((8 << 20) // (2 * f_p * x_item)) // 8 * 8)
    if n <= tm_budget:
        tm, n_p = n, n
    else:
        tm = tm_budget
        n_p = _round_up(n, tm)

    # Pad only what is actually needed (x / bias are tiny; weight pad is the
    # rare fallback above).
    if (n_p, f_p) != (n, f):
        x = jnp.zeros((n_p, f_p), x.dtype).at[:n, :f].set(x)
    if (o_p, f_p) != (o, f):
        w = jnp.zeros((o_p, f_p), w.dtype).at[:o, :f].set(w)
    b2 = b.reshape(1, o)
    if o_p != o:
        b2 = jnp.zeros((1, o_p), b.dtype).at[:, :o].set(b2)

    grid = (n_p // tm, o_p // tn, f_p // tk)
    n_k = grid[2]

    needs_scratch = jnp.dtype(out_dtype) != jnp.dtype(jnp.float32)
    scratch_shapes = [pltpu.VMEM((tm, tn), jnp.float32)] if needs_scratch else []

    # Explicit VMEM budget from the real working set (double-buffered blocks),
    # clamped to stay inside v7x's 64 MiB physical VMEM.
    ws = (2 * tm * f_p * x_item        # resident x
          + 2 * tn * tk * w_item       # streamed weight
          + 2 * tn * b_item            # bias
          + 2 * tm * tn * out_item     # output
          + (tm * tn * 4 if needs_scratch else 0))
    vmem_limit = int(min(max(int(ws * 1.25) + (2 << 20), 16 << 20), 48 << 20))

    cost = pl.CostEstimate(
        flops=2 * n * f * o,
        transcendentals=0,
        bytes_accessed=(n * f * x_item + o * f * w_item
                        + o * b_item + n * o * out_item),
    )

    j_sem = pltpu.CORE_PARALLEL if use_core_parallel else "parallel"

    c_p = pl.pallas_call(
        _make_kernel(n_k, tk, needs_scratch),
        out_shape=jax.ShapeDtypeStruct((n_p, o_p), out_dtype),
        grid_spec=pltpu.PrefetchScalarGridSpec(
            num_scalar_prefetch=0,
            grid=grid,
            in_specs=[
                # x resident across the O and K axes (fetched once per i).
                pl.BlockSpec((tm, f_p), lambda i, j, k: (i, 0)),
                # weight streamed unpadded as [O, F]; if the profile still
                # shows exposed DMA here, add pipeline_mode=pl.Buffered(3).
                pl.BlockSpec((tn, tk), lambda i, j, k: (j, k)),
                pl.BlockSpec((1, tn), lambda i, j, k: (0, j)),
            ],
            out_specs=pl.BlockSpec((tm, tn), lambda i, j, k: (i, j)),
            scratch_shapes=scratch_shapes,
        ),
        compiler_params=pltpu.CompilerParams(
            dimension_semantics=("parallel", j_sem, "arbitrary"),
            vmem_limit_bytes=vmem_limit,
        ),
        cost_estimate=cost,
    )(x, w, b2)

    c = c_p if (n_p, o_p) == (n, o) else c_p[:n, :o]
    return feats_flat, c


def init_params(key, feature_size, output_class):
    # Deterministic init mimicking nn.Linear's U(-1/sqrt(F), 1/sqrt(F)).
    kw, kb = jax.random.split(key)
    bound = 1.0 / (feature_size ** 0.5)
    weight = jax.random.uniform(
        kw, (output_class, feature_size), jnp.float32, -bound, bound)
    bias = jax.random.uniform(
        kb, (output_class,), jnp.float32, -bound, bound)
    return weight, bias


if __name__ == "__main__":
    key = jax.random.PRNGKey(0)
    k_in, k_par, k_in2, k_par2 = jax.random.split(key, 4)

    # Small shapes consistent with the module: batch=2, feature_size=32,
    # output_class=8 -> single full-array tile, grid (1, 1, 1), zero padding.
    batch, feature_size, output_class = 2, 32, 8
    feats = jax.random.normal(k_in, (batch, feature_size), jnp.float32)
    weight, bias = init_params(k_par, feature_size, output_class)

    feats_flat, c = iclassifier_forward(feats, weight, bias)
    jax.block_until_ready((feats_flat, c))

    ref = feats.reshape(batch, -1) @ weight.T + bias
    assert feats_flat.shape == (batch, feature_size)
    assert c.shape == (batch, output_class)
    assert jnp.allclose(feats_flat, feats.reshape(batch, -1))
    assert jnp.allclose(c, ref, atol=1e-5, rtol=1e-5), "mismatch vs reference"

    # Second (still small) config that forces the real tiled path:
    # grid (2, 3, 2), unpadded weight streaming, resident x, in-kernel K slice.
    n2, f2, o2 = 16, 256, 384
    feats2 = jax.random.normal(k_in2, (n2, f2), jnp.float32)
    weight2, bias2 = init_params(k_par2, f2, o2)
    _, c2 = iclassifier_forward(feats2, weight2, bias2,
                                tm_cap=8, tn_cap=128, tk_cap=128)
    jax.block_until_ready(c2)
    ref2 = feats2 @ weight2.T + bias2
    assert jnp.allclose(c2, ref2, atol=1e-4, rtol=1e-4), "tiled path mismatch"

    print("KERNEL_OK")
</pallas_src>

<mosaic_0001>
module attributes {stable_mosaic.version = 11 : i64} {
  func.func @kernel(%arg0: i32, %arg1: i32, %arg2: i32, %arg3: memref<2x32xf32, #tpu.memory_space<vmem>>, %arg4: memref<8x32xf32, #tpu.memory_space<vmem>>, %arg5: memref<1x8xf32, #tpu.memory_space<vmem>>, %arg6: memref<2x8xf32, #tpu.memory_space<vmem>>) attributes {dimension_semantics = [#tpu.dimension_semantics<parallel>, #tpu.dimension_semantics<parallel>, #tpu.dimension_semantics<arbitrary>], iteration_bounds = array<i64: 1, 1, 1>, scalar_prefetch = 0 : i64, scratch_operands = 0 : i64, tpu.core_type = #tpu.core_type<tc>, window_params = [{transform_indices = @transform_0, window_bounds = array<i64: 2, 32>}, {transform_indices = @transform_1, window_bounds = array<i64: 8, 32>}, {transform_indices = @transform_2, window_bounds = array<i64: 1, 8>}, {transform_indices = @transform_3, window_bounds = array<i64: 2, 8>}]} {
    %c0_i32 = arith.constant 0 : i32
    %0 = arith.cmpi eq, %arg2, %c0_i32 : i32
    %1 = arith.extui %0 : i1 to i32
    %c0_i32_0 = arith.constant 0 : i32
    %2 = arith.cmpi ne, %1, %c0_i32_0 : i32
    scf.if %2 {
      %c0_8 = arith.constant 0 : index
      %c0_9 = arith.constant 0 : index
      %9 = vector.load %arg5[%c0_8, %c0_9] : memref<1x8xf32, #tpu.memory_space<vmem>>, vector<1x8xf32>
      %10 = vector.shape_cast %9 : vector<1x8xf32> to vector<1x8xf32>
      %11 = vector.broadcast %10 : vector<1x8xf32> to vector<2x8xf32>
      %c0_10 = arith.constant 0 : index
      %c0_11 = arith.constant 0 : index
      %12 = vector.load %arg6[%c0_10, %c0_11] : memref<2x8xf32, #tpu.memory_space<vmem>>, vector<2x8xf32>
      tpu.vector_store %arg6[%c0_10, %c0_11], %11 {strides = array<i32>} : memref<2x8xf32, #tpu.memory_space<vmem>>, vector<2x8xf32>,
    } else {
    }
    %c0 = arith.constant 0 : index
    %c0_1 = arith.constant 0 : index
    %3 = vector.load %arg3[%c0, %c0_1] : memref<2x32xf32, #tpu.memory_space<vmem>>, vector<2x32xf32>
    %c0_2 = arith.constant 0 : index
    %c0_3 = arith.constant 0 : index
    %4 = vector.load %arg6[%c0_2, %c0_3] : memref<2x8xf32, #tpu.memory_space<vmem>>, vector<2x8xf32>
    %c0_4 = arith.constant 0 : index
    %c0_5 = arith.constant 0 : index
    %5 = vector.load %arg4[%c0_4, %c0_5] : memref<8x32xf32, #tpu.memory_space<vmem>>, vector<8x32xf32>
    %cst = arith.constant dense<0.000000e+00> : vector<2x8xf32>
    %6 = tpu.matmul %3, %5, %cst {dimension_numbers = #tpu.dot_dimension_numbers<[1], [1], [0], [0], [0, 0, 1, 0], [], []>} : vector<2x32xf32>, vector<8x32xf32>, vector<2x8xf32> -> vector<2x8xf32>
    %7 = arith.addf %4, %6 : vector<2x8xf32>
    %c0_6 = arith.constant 0 : index
    %c0_7 = arith.constant 0 : index
    %8 = vector.load %arg6[%c0_6, %c0_7] : memref<2x8xf32, #tpu.memory_space<vmem>>, vector<2x8xf32>
    tpu.vector_store %arg6[%c0_6, %c0_7], %7 {strides = array<i32>} : memref<2x8xf32, #tpu.memory_space<vmem>>, vector<2x8xf32>,
    return
  }
  func.func @transform_0(%arg0: i32, %arg1: i32, %arg2: i32) -> (i32, i32) {
    %c0_i32 = arith.constant 0 : i32
    %c0_i32_0 = arith.constant 0 : i32
    return %arg0, %c0_i32 : i32, i32
  }
  func.func @transform_1(%arg0: i32, %arg1: i32, %arg2: i32) -> (i32, i32) {
    %c0_i32 = arith.constant 0 : i32
    return %arg1, %arg2 : i32, i32
  }
  func.func @transform_2(%arg0: i32, %arg1: i32, %arg2: i32) -> (i32, i32) {
    %c0_i32 = arith.constant 0 : i32
    %c0_i32_0 = arith.constant 0 : i32
    return %c0_i32, %arg1 : i32, i32
  }
  func.func @transform_3(%arg0: i32, %arg1: i32, %arg2: i32) -> (i32, i32) {
    %c0_i32 = arith.constant 0 : i32
    return %arg0, %arg1 : i32, i32
  }
}

</mosaic_0001>

<bundles_post_ra>
// kernel: tpu_custom_call.1
= control target key start
LH: loop header
LB: loop body
LE: loop exit
PB: predicated region body
PF: predicated region fallthrough
CT: control target
= control target key end

     0   :  { %8 = vsyncpa [#allocation3], 0  ;;  %s223_s0 = inlined_call_operand.hbm [shape: f32[2,32], index: 0, kind: input, shape index: {}]   ;;  %s224_s1 = inlined_call_operand.hbm [shape: f32[8,32], index: 1, kind: input, shape index: {}]   ;;  %s225_s2 = inlined_call_operand.vmem [shape: f32[1,8], index: 2, kind: input, shape index: {}]   ;;  %s226_s3 = inlined_call_operand.hbm [shape: f32[2,8], index: 3, kind: output, shape index: {}]  }
   0x1   :  { %9 = vsyncpa [#allocation6], 0 }
   0x2   :  { %10 = vsyncpa [#allocation4], 0  ;;  %s16_s14 = sshll.u32 %s223_s0, 4  ;;  %s188_s15 = smov [#allocation2]   ;;  %s17_s14 = int_to_ptr.hbm [resolvable:$true] %s16_s14 }
   0x3   :  { %s18_s16 = sshll.u32 %s188_s15, 4  ;;  %s27_s19 = sshll.u32 %s224_s1, 4  ;;  %s19_s16 = int_to_ptr.vmem [resolvable:$true] %s18_s16  ;;  %s28_s19 = int_to_ptr.hbm [resolvable:$true] %s27_s19 }
   0x4   :  { %21 = dma.hbm_to_vmem [thread:$0]  %s17_s14, 32, %s19_s16, [#allocation3]  }
   0x5   :  { %s189_s20 = smov [#allocation5]  }
   0x6   :  { %s29_s21 = sshll.u32 %s189_s20, 4  ;;  %s30_s21 = int_to_ptr.vmem [resolvable:$true] %s29_s21 }
   0x7   :  { %32 = dma.hbm_to_vmem [thread:$0]  %s28_s19, 128, %s30_s21, [#allocation6]  }
   0x8   :  { %182 = dma.done.wait [#allocation3], 32  }
   0x9   :  { %183 = vsyncadd [#allocation3], 4294967264 }
   0xa   :  { %184 = dma.done.wait [#allocation6], 128  }
   0xb   :  { %185 = vsyncadd [#allocation6], 4294967168  ;;  %vm56_vm0 = vcmask 261120   ;;  %vm51_vm1 = vcmask 58368   ;;  %v109_v0 = vld [vmem:[%s225_s2] ss:$0 sm:$0xff] }
   0xc   :  { %v55_v1 = vld [vmem:[#allocation5] sm:$0xff]  ;;  %v53_v2 = vld [vmem:[#allocation2] sm:$0x3]  ;;  %52 = vst.msk [vmem:[#allocation7] sm:$0x3] %vm51_vm1, %v109_v0  ;;  %s190_s1 = smov [#allocation7]  }
   0xd   :  { %104 = vmatpush.xpose.msk.msra.mxu0 %vm56_vm0, %v55_v1  ;;  %s91_s23 = sshll.u32 %s190_s1, 4  ;;  %s93_s26 = sshll.u32 %s226_s3, 4  ;;  %s92_s23 = int_to_ptr.vmem [resolvable:$true] %s91_s23  ;;  %s94_s26 = int_to_ptr.hbm [resolvable:$true] %s93_s26 }
  0x10   :  { %105 = vmatmul.msk.f32.vlgmr.msra.gmra.mxu0 %vm56_vm0, %v53_v2 }
  0x13   :  { %v54_v3 = vld [vmem:[#allocation7] sm:$0x3] }
  0x8d   :  { %v80_v4 = vpop.f32.mrf.mxu0 }
  0x8e   :  { %v83_v5 = vadd.f32 %v80_v4, %v54_v3 }
  0x90   :  { %85 = vst.msk [vmem:[#allocation7] sm:$0x3] %vm51_vm1, %v83_v5 }
  0x91   :  { %96 = dma.vmem_to_hbm [thread:$0]  %s92_s23, 32, %s94_s26, [#allocation4]  }
  0x92   :  { %186 = dma.done.wait [#allocation4], 32  }
  0x93   :  { %187 = vsyncadd [#allocation4], 4294967264 }
  0x94   :  { %101 = vsyncpa [#allocation3], 1 }
  0x95   :  { %102 = vsyncpa [#allocation6], 1 }
  0x96   :  { %103 = vsyncpa [#allocation4], 1 }

</bundles_post_ra>
